<compile_context>
chip_gen: v7x
topology: tpu7x:2x2x1
jax: 0.10.0
libtpu: 0.0.40
codegen_flags: <defaults>
</compile_context>

<pallas_src>
import math
from functools import partial

import numpy as np
import jax
import jax.numpy as jnp
from jax.experimental import pallas as pl
from jax.experimental.pallas import tpu as pltpu

NEG_BIG = -1e30  # bias value for padded vocab columns (pre-softmax)


def _round_up(x: int, m: int) -> int:
    return (x + m - 1) // m * m


# ------------------------------ kernel -------------------------------------
def _generator_kernel(x_ref, w_ref, b_ref, o_ref, m_ref, l_ref):
    """One (row-tile, pass, vocab-tile) step of fused Linear + log_softmax.

    Grid = (row_tiles, 2, vocab_tiles), vocab innermost.
      pass 0: online accumulation of per-row running max / sum-exp
      pass 1: recompute this tile's logits and store logits - logsumexp

    x: (TM, K)  bf16   row tile (resident across pass/vocab axes)
    w: (K, TN)  bf16   weight slice for this vocab tile
    b: (1, TN)  f32    bias slice (padded columns hold NEG_BIG)
    o: (TM, TN) f32    log-probability tile (written only on pass 1)
    m_ref, l_ref: (TM, 1) f32 scratch -- running max / running sum-exp
    """
    p = pl.program_id(1)

    @pl.when(jnp.logical_and(p == 0, pl.program_id(2) == 0))
    def _init():
        m_ref[...] = jnp.full_like(m_ref, NEG_BIG)
        l_ref[...] = jnp.zeros_like(l_ref)

    logits = (
        jnp.dot(x_ref[...], w_ref[...], preferred_element_type=jnp.float32)
        + b_ref[...]
    )

    @pl.when(p == 0)
    def _accumulate():
        m_prev = m_ref[...]
        m_new = jnp.maximum(m_prev, jnp.max(logits, axis=-1, keepdims=True))
        l_ref[...] = (
            l_ref[...] * jnp.exp(m_prev - m_new)
            + jnp.sum(jnp.exp(logits - m_new), axis=-1, keepdims=True)
        )
        m_ref[...] = m_new

    @pl.when(p == 1)
    def _emit():
        lse = m_ref[...] + jnp.log(l_ref[...])
        o_ref[...] = (logits - lse).astype(o_ref.dtype)


# ------------------------------ wrapper ------------------------------------
def generator_forward(params, x, *, row_tile: int = 256, col_tile: int = 2048,
                      mxu_dtype=jnp.bfloat16):
    """log_softmax(x @ W + b, axis=-1) for x of shape (..., d_model).

    params["w"]: (d_model, vocab)  == torch proj.weight.T
    params["b"]: (vocab,)
    """
    w = params["w"]
    b = params["b"]
    d_model, vocab = w.shape

    lead = x.shape[:-1]
    m = int(np.prod(lead)) if lead else 1
    x2 = x.reshape(m, d_model)

    # --- tile sizes (multiple of 16 sublanes covers bf16 packing; TN is a
    #     multiple of 128 lanes, 2048 default keeps v7x double-buffered blocks
    #     well under its 64 MiB VMEM while amortizing per-step overhead). ----
    tm = min(_round_up(row_tile, 16), _round_up(m, 16))
    tn = min(_round_up(col_tile, 128), _round_up(vocab, 128))

    # --- padding (skipped entirely in the aligned production case) ---------
    mp = _round_up(m, tm)
    vp = _round_up(vocab, tn)
    if mp != m:
        x2 = jnp.pad(x2, ((0, mp - m), (0, 0)))
    x2 = x2.astype(mxu_dtype)

    w_p = w.astype(mxu_dtype)
    b_p = b.astype(jnp.float32)
    if vp != vocab:
        w_p = jnp.pad(w_p, ((0, 0), (0, vp - vocab)))
        # Padded bias columns = -1e30: those logits never win the max and add
        # ~0 to sum-exp, so no in-kernel masking is required.
        b_p = jnp.pad(b_p, (0, vp - vocab), constant_values=NEG_BIG)
    b_p = b_p.reshape(1, vp)

    grid = (mp // tm, 2, vp // tn)

    flops = 2 * (2 * mp * d_model * vp)          # two vocab sweeps (MXU)
    bytes_accessed = (
        x2.size * x2.dtype.itemsize
        + 2 * w_p.size * w_p.dtype.itemsize      # weights streamed twice
        + 2 * b_p.size * 4
        + mp * vp * 4                            # output written once
    )

    out = pl.pallas_call(
        _generator_kernel,
        grid=grid,
        in_specs=[
            # x row tile: resident across the (pass, vocab) axes.
            pl.BlockSpec((tm, d_model), lambda i, p, j: (i, 0)),
            # weight / bias vocab slices, streamed along j on both passes.
            pl.BlockSpec((d_model, tn), lambda i, p, j: (0, j)),
            pl.BlockSpec((1, tn), lambda i, p, j: (0, j)),
        ],
        # During pass 0 the output index stays pinned at (i, 0) so nothing is
        # flushed to HBM; pass 1 walks (i, j) and each block is written once.
        out_specs=pl.BlockSpec((tm, tn), lambda i, p, j: (i, j * p)),
        out_shape=jax.ShapeDtypeStruct((mp, vp), jnp.float32),
        scratch_shapes=[
            pltpu.VMEM((tm, 1), jnp.float32),    # running max
            pltpu.VMEM((tm, 1), jnp.float32),    # running sum-exp
        ],
        compiler_params=pltpu.CompilerParams(
            dimension_semantics=("parallel", "arbitrary", "arbitrary"),
            # 48 MiB: above every generation's default scoped limit, with
            # headroom under v7x's 64 MiB physical VMEM.
            vmem_limit_bytes=48 * 1024 * 1024,
        ),
        cost_estimate=pl.CostEstimate(
            flops=flops,
            transcendentals=2 * mp * vp,
            bytes_accessed=bytes_accessed,
        ),
    )(x2, w_p, b_p)

    if mp != m or vp != vocab:
        out = out[:m, :vocab]
    return out.reshape(*lead, vocab)


# -------------------------------- main --------------------------------------
if __name__ == "__main__":
    key = jax.random.PRNGKey(0)
    kx, kw, kb = jax.random.split(key, 3)

    B, S, D_MODEL, VOCAB = 2, 8, 32, 64

    # nn.Linear(d_model, vocab) style init (uniform +/- 1/sqrt(d_model)).
    bound = 1.0 / math.sqrt(D_MODEL)
    params = {
        "w": jax.random.uniform(kw, (D_MODEL, VOCAB), jnp.float32, -bound, bound),
        "b": jax.random.uniform(kb, (VOCAB,), jnp.float32, -bound, bound),
    }
    x = jax.random.normal(kx, (B, S, D_MODEL), jnp.float32)

    out = generator_forward(params, x)
    out = jax.block_until_ready(out)

    # Pure-JAX reference with matching bf16 MXU inputs / f32 accumulation.
    logits_ref = (
        jnp.dot(
            x.reshape(-1, D_MODEL).astype(jnp.bfloat16),
            params["w"].astype(jnp.bfloat16),
            preferred_element_type=jnp.float32,
        )
        + params["b"]
    )
    ref = jax.nn.log_softmax(logits_ref, axis=-1).reshape(B, S, VOCAB)

    assert out.shape == (B, S, VOCAB)
    np.testing.assert_allclose(np.asarray(out), np.asarray(ref),
                               atol=1e-4, rtol=1e-4)
    assert np.allclose(np.exp(np.asarray(out)).sum(-1), 1.0, atol=1e-3)
    assert np.all(np.isfinite(np.asarray(out)))

    print("KERNEL_OK")
</pallas_src>

<mosaic_0001>
module attributes {stable_mosaic.version = 11 : i64} {
  func.func @_generator_kernel(%arg0: i32, %arg1: i32, %arg2: i32, %arg3: memref<16x32xbf16, #tpu.memory_space<vmem>>, %arg4: memref<32x128xbf16, #tpu.memory_space<vmem>>, %arg5: memref<1x128xf32, #tpu.memory_space<vmem>>, %arg6: memref<16x128xf32, #tpu.memory_space<vmem>>, %arg7: memref<16x1xf32, #tpu.memory_space<vmem>>, %arg8: memref<16x1xf32, #tpu.memory_space<vmem>>) attributes {dimension_semantics = [#tpu.dimension_semantics<parallel>, #tpu.dimension_semantics<arbitrary>, #tpu.dimension_semantics<arbitrary>], iteration_bounds = array<i64: 1, 2, 1>, scalar_prefetch = 0 : i64, scratch_operands = 2 : i64, tpu.core_type = #tpu.core_type<tc>, window_params = [{transform_indices = @transform_0, window_bounds = array<i64: 16, 32>}, {transform_indices = @transform_1, window_bounds = array<i64: 32, 128>}, {transform_indices = @transform_2, window_bounds = array<i64: 1, 128>}, {transform_indices = @transform_3, window_bounds = array<i64: 16, 128>}]} {
    %c0_i32 = arith.constant 0 : i32
    %0 = arith.cmpi eq, %arg1, %c0_i32 : i32
    %c0_i32_0 = arith.constant 0 : i32
    %1 = arith.cmpi eq, %arg2, %c0_i32_0 : i32
    %2 = arith.andi %0, %1 : i1
    %3 = arith.extui %2 : i1 to i32
    %c0_i32_1 = arith.constant 0 : i32
    %4 = arith.cmpi ne, %3, %c0_i32_1 : i32
    scf.if %4 {
      %cst_10 = arith.constant -1.000000e+30 : f32
      %17 = vector.broadcast %cst_10 : f32 to vector<16x1xf32>
      %c0_11 = arith.constant 0 : index
      %c0_12 = arith.constant 0 : index
      %18 = vector.load %arg7[%c0_11, %c0_12] : memref<16x1xf32, #tpu.memory_space<vmem>>, vector<16x1xf32>
      tpu.vector_store %arg7[%c0_11, %c0_12], %17 {strides = array<i32>} : memref<16x1xf32, #tpu.memory_space<vmem>>, vector<16x1xf32>,
      %cst_13 = arith.constant 0.000000e+00 : f32
      %19 = vector.broadcast %cst_13 : f32 to vector<16x1xf32>
      %c0_14 = arith.constant 0 : index
      %c0_15 = arith.constant 0 : index
      %20 = vector.load %arg8[%c0_14, %c0_15] : memref<16x1xf32, #tpu.memory_space<vmem>>, vector<16x1xf32>
      tpu.vector_store %arg8[%c0_14, %c0_15], %19 {strides = array<i32>} : memref<16x1xf32, #tpu.memory_space<vmem>>, vector<16x1xf32>,
    } else {
    }
    %c0 = arith.constant 0 : index
    %c0_2 = arith.constant 0 : index
    %5 = vector.load %arg3[%c0, %c0_2] : memref<16x32xbf16, #tpu.memory_space<vmem>>, vector<16x32xbf16>
    %c0_3 = arith.constant 0 : index
    %c0_4 = arith.constant 0 : index
    %6 = vector.load %arg4[%c0_3, %c0_4] : memref<32x128xbf16, #tpu.memory_space<vmem>>, vector<32x128xbf16>
    %cst = arith.constant dense<0.000000e+00> : vector<16x128xf32>
    %7 = tpu.matmul %5, %6, %cst {dimension_numbers = #tpu.dot_dimension_numbers<[1], [0], [0], [1], [0, 0, 1, 1], [], []>} : vector<16x32xbf16>, vector<32x128xbf16>, vector<16x128xf32> -> vector<16x128xf32>
    %c0_5 = arith.constant 0 : index
    %c0_6 = arith.constant 0 : index
    %8 = vector.load %arg5[%c0_5, %c0_6] : memref<1x128xf32, #tpu.memory_space<vmem>>, vector<1x128xf32>
    %9 = vector.broadcast %8 : vector<1x128xf32> to vector<16x128xf32>
    %10 = arith.addf %7, %9 : vector<16x128xf32>
    %c0_i32_7 = arith.constant 0 : i32
    %11 = arith.cmpi eq, %arg1, %c0_i32_7 : i32
    %12 = arith.extui %11 : i1 to i32
    %c0_i32_8 = arith.constant 0 : i32
    %13 = arith.cmpi ne, %12, %c0_i32_8 : i32
    scf.if %13 {
      %c0_10 = arith.constant 0 : index
      %c0_11 = arith.constant 0 : index
      %17 = vector.load %arg7[%c0_10, %c0_11] : memref<16x1xf32, #tpu.memory_space<vmem>>, vector<16x1xf32>
      %cst_12 = arith.constant dense<0xFF800000> : vector<16xf32>
      %18 = vector.multi_reduction <maximumf>, %10, %cst_12 [1] : vector<16x128xf32> to vector<16xf32>
      %19 = vector.shape_cast %18 : vector<16xf32> to vector<16x1xf32>
      %20 = arith.maximumf %17, %19 : vector<16x1xf32>
      %c0_13 = arith.constant 0 : index
      %c0_14 = arith.constant 0 : index
      %21 = vector.load %arg8[%c0_13, %c0_14] : memref<16x1xf32, #tpu.memory_space<vmem>>, vector<16x1xf32>
      %22 = arith.subf %17, %20 : vector<16x1xf32>
      %23 = math.exp %22 : vector<16x1xf32>
      %24 = arith.mulf %21, %23 : vector<16x1xf32>
      %25 = vector.broadcast %20 : vector<16x1xf32> to vector<16x128xf32>
      %26 = arith.subf %10, %25 : vector<16x128xf32>
      %27 = math.exp %26 : vector<16x128xf32>
      %cst_15 = arith.constant dense<0.000000e+00> : vector<16xf32>
      %28 = vector.multi_reduction <add>, %27, %cst_15 [1] : vector<16x128xf32> to vector<16xf32>
      %29 = vector.shape_cast %28 : vector<16xf32> to vector<16x1xf32>
      %30 = arith.addf %24, %29 : vector<16x1xf32>
      %c0_16 = arith.constant 0 : index
      %c0_17 = arith.constant 0 : index
      %31 = vector.load %arg8[%c0_16, %c0_17] : memref<16x1xf32, #tpu.memory_space<vmem>>, vector<16x1xf32>
      tpu.vector_store %arg8[%c0_16, %c0_17], %30 {strides = array<i32>} : memref<16x1xf32, #tpu.memory_space<vmem>>, vector<16x1xf32>,
      %c0_18 = arith.constant 0 : index
      %c0_19 = arith.constant 0 : index
      %32 = vector.load %arg7[%c0_18, %c0_19] : memref<16x1xf32, #tpu.memory_space<vmem>>, vector<16x1xf32>
      tpu.vector_store %arg7[%c0_18, %c0_19], %20 {strides = array<i32>} : memref<16x1xf32, #tpu.memory_space<vmem>>, vector<16x1xf32>,
    } else {
    }
    %c1_i32 = arith.constant 1 : i32
    %14 = arith.cmpi eq, %arg1, %c1_i32 : i32
    %15 = arith.extui %14 : i1 to i32
    %c0_i32_9 = arith.constant 0 : i32
    %16 = arith.cmpi ne, %15, %c0_i32_9 : i32
    scf.if %16 {
      %c0_10 = arith.constant 0 : index
      %c0_11 = arith.constant 0 : index
      %17 = vector.load %arg7[%c0_10, %c0_11] : memref<16x1xf32, #tpu.memory_space<vmem>>, vector<16x1xf32>
      %c0_12 = arith.constant 0 : index
      %c0_13 = arith.constant 0 : index
      %18 = vector.load %arg8[%c0_12, %c0_13] : memref<16x1xf32, #tpu.memory_space<vmem>>, vector<16x1xf32>
      %19 = math.log %18 : vector<16x1xf32>
      %20 = arith.addf %17, %19 : vector<16x1xf32>
      %21 = vector.broadcast %20 : vector<16x1xf32> to vector<16x128xf32>
      %22 = arith.subf %10, %21 : vector<16x128xf32>
      %c0_14 = arith.constant 0 : index
      %c0_15 = arith.constant 0 : index
      %23 = vector.load %arg6[%c0_14, %c0_15] : memref<16x128xf32, #tpu.memory_space<vmem>>, vector<16x128xf32>
      tpu.vector_store %arg6[%c0_14, %c0_15], %22 {strides = array<i32>} : memref<16x128xf32, #tpu.memory_space<vmem>>, vector<16x128xf32>,
    } else {
    }
    return
  }
  func.func @transform_0(%arg0: i32, %arg1: i32, %arg2: i32) -> (i32, i32) {
    %c0_i32 = arith.constant 0 : i32
    %c0_i32_0 = arith.constant 0 : i32
    return %arg0, %c0_i32 : i32, i32
  }
  func.func @transform_1(%arg0: i32, %arg1: i32, %arg2: i32) -> (i32, i32) {
    %c0_i32 = arith.constant 0 : i32
    %c0_i32_0 = arith.constant 0 : i32
    return %c0_i32, %arg2 : i32, i32
  }
  func.func @transform_2(%arg0: i32, %arg1: i32, %arg2: i32) -> (i32, i32) {
    %c0_i32 = arith.constant 0 : i32
    %c0_i32_0 = arith.constant 0 : i32
    return %c0_i32, %arg2 : i32, i32
  }
  func.func @transform_3(%arg0: i32, %arg1: i32, %arg2: i32) -> (i32, i32) {
    %0 = arith.muli %arg2, %arg1 : i32
    %c0_i32 = arith.constant 0 : i32
    return %arg0, %0 : i32, i32
  }
}

</mosaic_0001>

<bundles_post_ra>
// kernel: tpu_custom_call.1
= control target key start
LH: loop header
LB: loop body
LE: loop exit
PB: predicated region body
PF: predicated region fallthrough
CT: control target
= control target key end

     0   :  { %8 = vsyncpa [#allocation5], 0  ;;  %s938_s0 = inlined_call_operand.hbm [shape: bf16[16,32], index: 0, kind: input, shape index: {}]   ;;  %s939_s1 = inlined_call_operand.hbm [shape: bf16[32,128], index: 1, kind: input, shape index: {}]   ;;  %s940_s2 = inlined_call_operand.vmem [shape: f32[1,128], index: 2, kind: input, shape index: {}]   ;;  %s941_s3 = inlined_call_operand.hbm [shape: f32[16,128], index: 3, kind: output, shape index: {}]  }
   0x1   :  { %9 = vsyncpa [#allocation8], 0 }
   0x2   :  { %10 = vsyncpa [#allocation6], 0 }
   0x3   :  { %12 = vsyncpa [#allocation6 + $0x1], 0  ;;  %s783_s12 = smov 0   ;;  %s785_s13 = smov 0  }
   0x4   :  { %s787_s14 = smov 0  }
   0x5 LB: > { %s514_s15 = sadd.s32 4294967295, %s748_s14   ;;  %s515_s16 = sadd.s32 4294967294, %s748_s14   ;;  %s748_s14 = sphi %s787_s14, %s18_s14   ;;  %s744_s13 = sphi %s785_s13, %s952_s13   ;;  %s740_s12 = sphi %s783_s12, %s951_s12  }
   0x6   : > { %s33_s17 = sadd.s32 1, %s744_s13  ;;  %p516_p0 = scmp.ge.s32.totalorder %s748_s14, 1 }
   0x7   : > { %p35_p1 = scmp.ge.s32.totalorder %s33_s17, 2  ;;  %p150_p2 = scmp.lt.s32.totalorder %s748_s14, 3 }
   0x8   : > { %p805_p3 = scmp.eq.s32.totalorder %s514_s15, 0  ;;  %s750_s20 = smov [#allocation4]  }
   0x9   : > { %s954_s17 = smov (%p35_p1, %s33_s17), 0  ;;  %p811_p4 = pnand %p516_p0, %p150_p2 }
   0xa   : > { %s945_s18 = scalar_select %p805_p3, 1, 0 }
   0xb   : > { %s946_s19 = scalar_select %p811_p4, 1, 0 }
   0xc   : > { %s165_s21 = sshll.u32 %s750_s20, 4  ;;  %p559_p5 = pneg %p811_p4  ;;  %s166_s21 = int_to_ptr.vmem [resolvable:$true] %s165_s21 }
   0xd   : > { %s751_s23 = smov [#allocation7]   ;;  %s632_s27 = scalar_lea.hbm %s938_s0, 128 }
   0xe   : > { %p819_p6 = pnand %p805_p3, %p559_p5  ;;  %s180_s24 = sshll.u32 %s751_s23, 4  ;;  %s823_s24 = int_to_ptr.vmem [resolvable:$true] %s180_s24 }
   0xf   : > { %p633_p7 = scmp.ne.s32.totalorder %s938_s0, %s632_s27  ;;  %p639_p11 = scmp.lt.u32.totalorder %s632_s27, %s938_s0 }
  0x10   : > { %p634_p8 = pneg %p819_p6 }
  0x12   : > { %p635_p9 = pnand %p634_p8, %p633_p7 }
  0x14   : > { %p636_p10 = pneg %p635_p9 }
  0x16   : > { %p641_p12 = pnand %p639_p11, %p636_p10 }
  0x18   : > { %644 = shalt.err (!%p641_p12)
}
  0x19   : > { %s645_s5 = scalar_lea.vmem %s166_s21, 128  ;;  %p653_p2 = scmp.lt.s32.totalorder %s166_s21, %s166_s21 }
  0x1a   : > { %p646_p13 = scmp.ne.s32.totalorder %s166_s21, %s645_s5  ;;  %p654_p5 = scmp.lt.s32.totalorder %s645_s5, %s645_s5 }
  0x1c   : > { %p648_p0 = pnand %p646_p13, %p634_p8  ;;  %p655_p3 = por %p654_p5, %p653_p2 }
  0x1e   : > { %p649_p1 = pneg %p648_p0 }
  0x20   : > { %p656_p4 = pnand %p655_p3, %p649_p1 }
  0x22   : > { %659 = shalt.err (!%p656_p4)
}
  0x23   : > { %s752_s6 = smov 64   ;;  %s753_s7 = smov 4  }
  0x24   : > { %562 = dma.hbm_to_vmem [thread:$0]  (!%p819_p6), %s938_s0, 128, %s166_s21, [#allocation5], %s752_s6, %s752_s6, %s753_s7  }
  0x25   : > { %s660_s20 = scalar_lea.hbm %s939_s1, 256 }
  0x26   : > { %p661_p7 = scmp.ne.s32.totalorder %s939_s1, %s660_s20  ;;  %p667_p9 = scmp.lt.u32.totalorder %s660_s20, %s939_s1 }
  0x28   : > { %p663_p3 = pnand %p661_p7, %p634_p8 }
  0x2a   : > { %p664_p4 = pneg %p663_p3 }
  0x2c   : > { %p669_p10 = pnand %p667_p9, %p664_p4 }
  0x2e   : > { %672 = shalt.err (!%p669_p10)
}
  0x2f   : > { %s673_s21 = scalar_lea.vmem %s823_s24, 256  ;;  %p681_p0 = scmp.lt.s32.totalorder %s823_s24, %s823_s24 }
  0x30   : > { %p674_p11 = scmp.ne.s32.totalorder %s823_s24, %s673_s21  ;;  %p682_p1 = scmp.lt.s32.totalorder %s673_s21, %s673_s21 }
  0x32   : > { %p676_p12 = pnand %p674_p11, %p634_p8  ;;  %p683_p2 = por %p682_p1, %p681_p0 }
  0x34   : > { %p677_p13 = pneg %p676_p12 }
  0x36   : > { %p684_p5 = pnand %p683_p2, %p677_p13 }
  0x38   : > { %687 = shalt.err (!%p684_p5)
}
  0x39   : > { %565 = dma.hbm_to_vmem [thread:$0]  (!%p819_p6), %s939_s1, 256, %s823_s24, [#allocation8], %s752_s6, %s752_s6, %s753_s7  }
  0x3a   : > { %p948_p7 = scmp.ne.s32.totalorder %s946_s19, 0 }
  0x3b   : > { %p949_p3 = scmp.ne.s32.totalorder (!%p948_p7), %s945_s18, 0 }
  0x3c   : > { %202 = sbr.rel (%p948_p7) target bundleno = 915 (0x393), region = 32 }
  0x43   : > { %727 = dma.done.wait (%p949_p3), [#allocation5], 128  }
  0x44   : > { %729 = vsyncadd (%p949_p3), [#allocation5], 4294967168 }
  0x45   : > { %731 = dma.done.wait (%p949_p3), [#allocation8], 256  }
  0x46   : > { %733 = vsyncadd (%p949_p3), [#allocation8], 4294967040  ;;  %p235_p8 = scmp.eq.s32.totalorder %s740_s12, 0 }
  0x47   : > { %vm241_vm0 = vcmask (%p235_p8), 7168   ;;  %v754_v0 = vmov (%p235_p8), -1e+30   ;;  %v755_v1 = vmov (%p235_p8), 0.0  }
  0x48   : > { %240 = sbr.rel (!%p235_p8) target bundleno = 79 (0x4f), region = 44  ;;  %242 = vst.msk [vmem:[#allocation2] sm:$0xff] (%p235_p8), %vm241_vm0, %v754_v0  ;;  %243 = vst.msk [vmem:[#allocation2 + $0x8] sm:$0xff] (%p235_p8), %vm241_vm0, %v754_v0 }
  0x49   : > { %244 = vst.msk [vmem:[#allocation3] sm:$0xff] (%p235_p8), %vm241_vm0, %v755_v1  ;;  %245 = vst.msk [vmem:[#allocation3 + $0x8] sm:$0xff] (%p235_p8), %vm241_vm0, %v755_v1 }
  0x4f PF: > { %v614_v2 = vld [vmem:[#allocation7] sm:$0xff]   ;;  %v756_v3 = vmov 0.0   ;;  %v615_v4 = vld [vmem:[#allocation7 + $0x8] sm:$0xff]   ;;  %vm757_vm1 = vmmov 0   ;;  %v616_v5 = vld [vmem:[#allocation4] sm:$0xff]   ;;  %vm276_vm2 = vcmask 261120  }
  0x50   : > { %539 = vmatprep.subr.bf16.mxu0 %v756_v3  ;;  %543 = vmatprep.mubr.msk.bf16.mxu0 %vm757_vm1, %v756_v3  ;;  %v524_v6 = vld [vmem:[%s940_s2] ss:$0 sm:$0xff]  ;;  %p529_p6 = scmp.ne.s32.totalorder %s740_s12, 0 }
  0x51   : > { %540 = vmatpush3.bf16.msra.mxu0 %v614_v2  ;;  %v758_v13 = vmov (!%p529_p6), 0   ;;  %v324_v14 = vld [vmem:[#allocation2] sm:$0xff] (!%p529_p6)  ;;  %vm364_vm3 = vcmask (!%p529_p6), 7168   ;;  %v325_v17 = vld [vmem:[#allocation2 + $0x8] sm:$0xff] (!%p529_p6)  ;;  %v332_v33 = vld [vmem:[#allocation3] sm:$0xff] (!%p529_p6) }
  0x52   : > { %541 = vmatprep.subr.bf16.mxu0 %v756_v3  ;;  %617 = vset.pattern.permute.xlu1 (!%p529_p6), %v758_v13  ;;  %v333_v37 = vld [vmem:[#allocation3 + $0x8] sm:$0xff] (!%p529_p6) }
  0x53   : > { %618 = vset.pattern.permute.xlu0 (!%p529_p6), %v758_v13 }
  0x55   : > { %542 = vmatpush3.bf16.msra.mxu0 %v615_v4 }
  0x58   : > { %544 = vmatmul.mubr.msk.bf16.vlgmr.msra.gmra.mrb[0].mxu0 %vm276_vm2, %v616_v5 }
 0x128   : > { %323 = sbr.rel (%p529_p6) target bundleno = 738 (0x2e2), region = 48 }
 0x12b   : > { %v314_v7 = vpop.f32.mrb[0].mxu0 }
 0x12c   : > { %v886_v8 = vadd.f32 %v524_v6, %v314_v7  ;;  %v545_v9 = vpop.f32.mrb[1].mxu0 }
 0x12d   : > { %v317_v10 = vpop.f32.mrb[2].mxu0 }
 0x12e   : > { %v888_v11 = vadd.f32 %v524_v6, %v317_v10  ;;  %v546_v12 = vpop.f32.mrb[3].mxu0  ;;  %326 = vmax.xlane.f32.xlu0 (!%p529_p6), %v886_v8 }
 0x132   : > { %328 = vmax.xlane.f32.xlu0 %v888_v11 }
 0x1bb   : > { %v327_v15 = vpop.xlane.xlu0 %326 }
 0x1bc   : > { %v330_v16 = vmax.f32 %v324_v14, %v327_v15 }
 0x1be   : > { %v334_v18 = vsub.f32 %v324_v14, %v330_v16  ;;  %367 = vst.msk [vmem:[#allocation2] sm:$0xff] %vm364_vm3, %v330_v16  ;;  %344 = vperm.xlu1 %617, %v330_v16  }
 0x1bf   : > { %v329_v19 = vpop.xlane.xlu0 %328 }
 0x1c0   : > { %v331_v20 = vmax.f32 %v325_v17, %v329_v19  ;;  %v336_v30 = vmul.f32 1.442695, %v334_v18 }
 0x1c2   : > { %v335_v21 = vsub.f32 %v325_v17, %v331_v20  ;;  %368 = vst.msk [vmem:[#allocation2 + $0x8] sm:$0xff] %vm364_vm3, %v331_v20  ;;  %349 = vperm.xlu1 %617, %v331_v20  }
 0x1c4   : > { %v338_v31 = vmul.f32 1.442695, %v335_v21 }
 0x23d   : > { %v345_v22 = vpop.permute.xlu1 %344 }
 0x23e   : > { %v352_v23 = vsub.f32 %v886_v8, %v345_v22 }
 0x240   : > { %v354_v24 = vmul.f32 1.442695, %v352_v23 }
 0x241   : > { %v350_v25 = vpop.permute.xlu1 %349 }
 0x242   : > { %619 = vpow2.f32 %v354_v24  ;;  %v353_v26 = vsub.f32 %v888_v11, %v350_v25 }
 0x244   : > { %v356_v27 = vmul.f32 1.442695, %v353_v26 }
 0x246   : > { %621 = vpow2.f32 %v356_v27 }
 0x247   : > { %623 = vpow2.f32 %v336_v30 }
 0x248   : > { %625 = vpow2.f32 %v338_v31 }
 0x24c   : > { %v620_v28 = vpop.eup %619 }
 0x24d   : > { %358 = vadd.xlane.f32.xlu0 %v620_v28 }
 0x250   : > { %v622_v29 = vpop.eup %621 }
 0x251   : > { %360 = vadd.xlane.f32.xlu1 %v622_v29  ;;  %v624_v32 = vpop.eup %623 }
 0x252   : > { %v340_v34 = vmul.f32 %v624_v32, %v332_v33  ;;  %v626_v35 = vpop.eup %625 }
 0x253   : > { %v341_v39 = vmul.f32 %v626_v35, %v333_v37 }
 0x2da   : > { %v359_v36 = vpop.xlane.xlu0 %358 }
 0x2db   : > { %v362_v38 = vadd.f32 %v359_v36, %v340_v34 }
 0x2dd   : > { %365 = vst.msk [vmem:[#allocation3] sm:$0xff] %vm364_vm3, %v362_v38 }
 0x2de   : > { %v361_v40 = vpop.xlane.xlu1 %360 }
 0x2df   : > { %v363_v41 = vadd.f32 %v361_v40, %v341_v39 }
 0x2e1   : > { %366 = vst.msk [vmem:[#allocation3 + $0x8] sm:$0xff] %vm364_vm3, %v363_v41 }
 0x2e2 PF: > { %p530_p4 = scmp.ne.s32.totalorder %s740_s12, 1 }
 0x2e3   : > { %v759_v43 = vmov (!%p530_p4), 0   ;;  %v373_v46 = vld [vmem:[#allocation2] sm:$0xff] (!%p530_p4)  ;;  %v374_v49 = vld [vmem:[#allocation2 + $0x8] sm:$0xff] (!%p530_p4) }
 0x2e4   : > { %372 = sbr.rel (%p530_p4) target bundleno = 891 (0x37b), region = 52  ;;  %v375_v42 = vld [vmem:[#allocation3] sm:$0xff] (!%p530_p4)  ;;  %627 = vset.pattern.permute.xlu0 (!%p530_p4), %v759_v43 }
 0x2e5   : > { %628 = vlog2.f32 (!%p530_p4), %v375_v42 }
 0x2e8   : > { %v376_v44 = vld [vmem:[#allocation3 + $0x8] sm:$0xff] (!%p530_p4) }
 0x2e9   : > { %630 = vlog2.f32 (!%p530_p4), %v376_v44 }
 0x2ef   : > { %v629_v45 = vpop.eup %628 }
 0x2f0   : > { %v378_v48 = vmul.f32 0.6931472, %v629_v45 }
 0x2f2   : > { %v381_v51 = vadd.f32 %v378_v48, %v373_v46 }
 0x2f3   : > { %v631_v47 = vpop.eup %630 }
 0x2f4   : > { %v380_v50 = vmul.f32 0.6931472, %v631_v47  ;;  %385 = vperm.xlu0 %627, %v381_v51  }
 0x2f6   : > { %v382_v52 = vadd.f32 %v380_v50, %v374_v49 }
 0x2f8   : > { %390 = vperm.xlu0 %627, %v382_v52  }
 0x373   : > { %v386_v53 = vpop.permute.xlu0 %385 }
 0x374   : > { %v393_v54 = vsub.f32 %v886_v8, %v386_v53 }
 0x376   : > { %395 = vst [vmem:[#allocation9] sm:$0xff] %v393_v54 }
 0x377   : > { %v391_v55 = vpop.permute.xlu0 %390 }
 0x378   : > { %v394_v56 = vsub.f32 %v888_v11, %v391_v55 }
 0x37a   : > { %396 = vst [vmem:[#allocation9 + $0x8] sm:$0xff] %v394_v56 }
 0x37b PF: > { %p904_p9 = scmp.eq.s32.totalorder %s514_s15, 1  ;;  %s760_s22 = smov [#allocation9]  }
 0x37c   : > { %s413_s24 = sshll.u32 %s760_s22, 4  ;;  %s414_s24 = int_to_ptr.vmem [resolvable:$true] %s413_s24 }
 0x37d   : > { %s688_s30 = scalar_lea.vmem %s414_s24, 256  ;;  %s694_s4 = scalar_lea.vmem %s414_s24, 512 }
 0x37e   : > { %p689_p10 = scmp.ne.s32.totalorder %s414_s24, %s688_s30  ;;  %p695_p13 = scmp.lt.s32.totalorder %s414_s24, %s414_s24 }
 0x37f   : > { %p696_p0 = scmp.lt.s32.totalorder %s694_s4, %s688_s30 }
 0x380   : > { %p690_p11 = pnand %p689_p10, %p904_p9 }
 0x381   : > { %p697_p1 = por %p696_p0, %p695_p13 }
 0x382   : > { %p691_p12 = pneg %p690_p11 }
 0x384   : > { %p698_p2 = pnand %p697_p1, %p691_p12 }
 0x386   : > { %701 = shalt.err (!%p698_p2)
}
 0x387   : > { %s702_s6 = scalar_lea.hbm %s941_s3, 256 }
 0x388   : > { %p703_p5 = scmp.ne.s32.totalorder %s941_s3, %s702_s6  ;;  %p708_p8 = scmp.lt.u32.totalorder %s702_s6, %s941_s3 }
 0x38a   : > { %p704_p7 = pnand %p703_p5, %p904_p9 }
 0x38c   : > { %p705_p3 = pneg %p704_p7 }
 0x38e   : > { %p710_p6 = pnand %p708_p8, %p705_p3 }
 0x390   : > { %713 = shalt.err (!%p710_p6)
}
 0x391   : > { %s761_s11 = smov 128   ;;  %s762_s20 = smov 8  }
 0x392   : > { %556 = dma.vmem_to_hbm [thread:$0]  (%p904_p9), %s414_s24, 256, %s941_s3, [#allocation6], %s761_s11, %s761_s11, %s762_s20  }
 0x393 PF: > { %p575_p4 = scmp.ge.s32.totalorder %s748_s14, 2  ;;  %p576_p10 = scmp.eq.s32.totalorder %s515_s16, 1 }
 0x395   : > { %p567_p11 = pnand %p576_p10, %p575_p4 }
 0x397   : > { %735 = dma.done.wait (!%p567_p11), [#allocation6], 256  }
 0x398   : > { %737 = vsyncadd (!%p567_p11), [#allocation6], 4294967040  ;;  %s18_s14 = sadd.s32 1, %s748_s14   ;;  %s951_s12 = smov %s744_s13 }
 0x399   : > { %p15_p12 = scmp.ge.s32.totalorder %s18_s14, 4   ;;  %s952_s13 = smov %s954_s17 }
 0x39b   :  { %17 = sbr.rel (!%p15_p12) target bundleno = 5 (0x5), region = 90 }
 0x3a2   :  { %434 = vsyncpa [#allocation5], 1 }
 0x3a3   :  { %436 = vsyncpa [#allocation5 + $0x1], 1 }
 0x3a4   :  { %437 = vsyncpa [#allocation8], 1 }
 0x3a5   :  { %438 = vsyncpa [#allocation6], 1 }
 0x3a6   :  { %440 = vsyncpa [#allocation6 + $0x1], 1 }

</bundles_post_ra>
